<compile_context>
chip_gen: v5e
topology: v5e:2x2
jax: 0.10.0
libtpu: 0.0.40
codegen_flags: <defaults>
</compile_context>

<pallas_src>
import functools

import jax
import jax.numpy as jnp
from jax.experimental import pallas as pl
from jax.experimental.pallas import tpu as pltpu


def _round_up(x, m):
    return ((x + m - 1) // m) * m


# ---------------------------------------------------------------------------
# VectorQuantizer kernel
# ---------------------------------------------------------------------------
def _vq_kernel(z_ref, cbt_ref, cb_ref, half_csq_ref, zq_ref, idx_ref, err_ref):
    # z_ref:        (TN, D) tile of latent vectors
    # cbt_ref:      (D, K)  codebook, pre-transposed (resident)
    # cb_ref:       (K, D)  codebook (resident, for the one-hot gather)
    # half_csq_ref: (1, K)  0.5 * ||c_k||^2, precomputed in the wrapper
    # zq_ref:       (TN, D) quantized output tile
    # idx_ref:      (TN, 1) int32 argmin indices
    # err_ref:      (TN, 1) per-row squared error (summed in the wrapper)
    z = z_ref[...]                                                    # (TN, D)

    cross = jnp.dot(z, cbt_ref[...], preferred_element_type=jnp.float32)  # (TN, K) MXU
    # argmin_k ||z - c_k||^2 == argmin_k (0.5*||c_k||^2 - z . c_k); the per-row
    # ||z||^2 constant and the factor 2 do not change the argmin.
    score = half_csq_ref[...] - cross                                 # (TN, K)
    idx = jnp.argmin(score, axis=-1)                                  # (TN,) first-min

    # Gather codebook rows with a one-hot matmul (exact: one nonzero per row).
    onehot = (jax.lax.broadcasted_iota(jnp.int32, score.shape, 1)
              == idx[:, None]).astype(cb_ref.dtype)                   # (TN, K)
    z_q = jnp.dot(onehot, cb_ref[...], preferred_element_type=jnp.float32)  # (TN, D)

    zq_ref[...] = z_q.astype(zq_ref.dtype)
    idx_ref[...] = idx.astype(jnp.int32)[:, None]
    diff = z_q - z.astype(jnp.float32)
    err_ref[...] = jnp.sum(diff * diff, axis=-1, keepdims=True)       # (TN, 1)


def vector_quantizer(z, codebook, beta=1.0, *, tile_n=512):
    """Forward pass of VectorQuantizer. Returns (z_q_st, vq_loss, indices)."""
    N, D = z.shape
    K, Dc = codebook.shape
    assert D == Dc

    # Lane-friendly tile size; pad N instead of falling back to one huge tile.
    tile_n = _round_up(max(1, min(tile_n, _round_up(N, 128))), 128)
    n_pad = _round_up(N, tile_n)
    num_tiles = n_pad // tile_n

    z32 = z.astype(jnp.float32)
    if n_pad != N:
        z32 = jnp.pad(z32, ((0, n_pad - N), (0, 0)))

    cb32 = codebook.astype(jnp.float32)
    cbt = cb32.T                                                # (D, K), hoisted
    half_csq = 0.5 * jnp.sum(cb32 * cb32, axis=-1)[None, :]     # (1, K), hoisted

    zq, idx2, err = pl.pallas_call(
        _vq_kernel,
        out_shape=(
            jax.ShapeDtypeStruct((n_pad, D), z.dtype),
            jax.ShapeDtypeStruct((n_pad, 1), jnp.int32),
            jax.ShapeDtypeStruct((n_pad, 1), jnp.float32),
        ),
        grid_spec=pltpu.PrefetchScalarGridSpec(
            num_scalar_prefetch=0,
            grid=(num_tiles,),
            in_specs=[
                pl.BlockSpec((tile_n, D), lambda i: (i, 0)),
                pl.BlockSpec((D, K), lambda i: (0, 0)),        # resident
                pl.BlockSpec((K, D), lambda i: (0, 0)),        # resident
                pl.BlockSpec((1, K), lambda i: (0, 0)),        # resident
            ],
            out_specs=[
                pl.BlockSpec((tile_n, D), lambda i: (i, 0)),
                pl.BlockSpec((tile_n, 1), lambda i: (i, 0)),
                pl.BlockSpec((tile_n, 1), lambda i: (i, 0)),
            ],
        ),
        compiler_params=pltpu.CompilerParams(
            # No cross-iteration state -> parallel grid (shards across TCs on v7x).
            dimension_semantics=("parallel",),
        ),
    )(z32, cbt, cb32, half_csq)

    zq = zq[:N]
    indices = idx2[:N, 0]
    sse = jnp.sum(err[:N, 0])            # padded rows discarded before the sum
    mse = sse / (N * D)
    # codebook_loss == commitment_loss == mse in forward value.
    vq_loss = (1.0 + beta) * mse
    # TODO(synk): straight-through estimator / detach-based loss split are
    # backward-pass constructs; forward value of z + (z_q - z).detach() is z_q.
    z_q_st = zq
    return z_q_st, vq_loss, indices


# ---------------------------------------------------------------------------
# Linear (+ optional ReLU) kernel for the encoder/decoder MLPs
# ---------------------------------------------------------------------------
def _linear_kernel(x_ref, w_ref, b_ref, o_ref, *, relu):
    y = jnp.dot(x_ref[...], w_ref[...], preferred_element_type=jnp.float32)
    y = y + b_ref[...]
    if relu:
        y = jnp.maximum(y, 0.0)
    o_ref[...] = y.astype(o_ref.dtype)


def linear(x, w, b, *, relu=False):
    n, _ = x.shape
    dout = w.shape[1]
    return pl.pallas_call(
        functools.partial(_linear_kernel, relu=relu),
        out_shape=jax.ShapeDtypeStruct((n, dout), x.dtype),
    )(x, w, b.reshape(1, dout))


# ---------------------------------------------------------------------------
# VQVAE forward
# ---------------------------------------------------------------------------
def _mlp(x, layers):
    h = x
    for li, (w, b) in enumerate(layers):
        h = linear(h, w, b, relu=(li < len(layers) - 1))
    return h


def vqvae_forward(x, params, beta=1.0, *, tile_n=512):
    z = _mlp(x, params["encoder"])
    z_q, vq_loss, indices = vector_quantizer(z, params["codebook"], beta, tile_n=tile_n)
    x_hat = _mlp(z_q, params["decoder"])
    rec_loss = jnp.mean((x_hat - x) ** 2)     # scalar-loss glue stays in JAX
    return x_hat, vq_loss, rec_loss, indices


def _init_mlp(key, dims):
    layers = []
    for din, dout in dims:
        key, kw = jax.random.split(key)
        w = jax.random.normal(kw, (din, dout), jnp.float32) / jnp.sqrt(din)
        b = jnp.zeros((dout,), jnp.float32)
        layers.append((w, b))
    return layers


def _reference_quantizer(z, codebook, beta=1.0):
    z = z.astype(jnp.float32)
    cb = codebook.astype(jnp.float32)
    dist2 = (jnp.sum(z * z, -1, keepdims=True)
             + jnp.sum(cb * cb, -1)[None, :]
             - 2.0 * jnp.dot(z, cb.T, precision=jax.lax.Precision.HIGHEST))
    idx = jnp.argmin(dist2, axis=1)
    z_q = cb[idx]
    mse = jnp.mean((z_q - z) ** 2)
    return z_q, (1.0 + beta) * mse, idx


if __name__ == "__main__":
    num_codes, code_dim, beta = 128, 32, 1.0
    batch, in_dim = 300, 128            # non-multiple of the tile -> exercises padding

    root = jax.random.PRNGKey(0)
    k_x, k_cb, k_enc, k_dec = jax.random.split(root, 4)
    x = jax.random.normal(k_x, (batch, in_dim), dtype=jnp.float32)
    params = {
        "encoder": _init_mlp(k_enc, [(128, 512), (512, 256), (256, 64), (64, 32)]),
        "decoder": _init_mlp(k_dec, [(32, 64), (64, 256), (256, 512), (512, 128)]),
        "codebook": jax.random.normal(k_cb, (num_codes, code_dim), dtype=jnp.float32),
    }

    # Full VQVAE forward (tile_n=128 -> 3-tile grid at this small batch).
    x_hat, vq_loss, rec_loss, indices = jax.block_until_ready(
        vqvae_forward(x, params, beta=beta, tile_n=128)
    )

    # --- silent sanity checks vs. a pure-JAX quantizer reference -----------
    z = _mlp(x, params["encoder"])
    zq_k, loss_k, idx_k = vector_quantizer(z, params["codebook"], beta=beta, tile_n=128)
    zq_r, loss_r, idx_r = _reference_quantizer(z, params["codebook"], beta)

    assert x_hat.shape == x.shape and indices.shape == (batch,)
    assert jnp.all(idx_k == idx_r)
    assert jnp.all(idx_k == indices)
    assert jnp.allclose(zq_k, zq_r, atol=1e-5, rtol=1e-5)
    assert jnp.allclose(loss_k, loss_r, atol=1e-5, rtol=1e-5)
    assert jnp.allclose(vq_loss, loss_r, atol=1e-5, rtol=1e-5)
    assert bool(jnp.all(jnp.isfinite(x_hat))) and bool(jnp.isfinite(rec_loss))

    print("KERNEL_OK")
</pallas_src>

<mosaic_0001>
module attributes {stable_mosaic.version = 11 : i64} {
  func.func @_linear_kernel(%arg0: memref<300x128xf32, #tpu.memory_space<vmem>>, %arg1: memref<128x512xf32, #tpu.memory_space<vmem>>, %arg2: memref<1x512xf32, #tpu.memory_space<vmem>>, %arg3: memref<300x512xf32, #tpu.memory_space<vmem>>) attributes {dimension_semantics = [], scalar_prefetch = 0 : i64, scratch_operands = 0 : i64, tpu.core_type = #tpu.core_type<tc>} {
    %c0 = arith.constant 0 : index
    %c0_0 = arith.constant 0 : index
    %0 = vector.load %arg0[%c0, %c0_0] : memref<300x128xf32, #tpu.memory_space<vmem>>, vector<300x128xf32>
    %c0_1 = arith.constant 0 : index
    %c0_2 = arith.constant 0 : index
    %1 = vector.load %arg1[%c0_1, %c0_2] : memref<128x512xf32, #tpu.memory_space<vmem>>, vector<128x512xf32>
    %cst = arith.constant dense<0.000000e+00> : vector<300x512xf32>
    %2 = tpu.matmul %0, %1, %cst {dimension_numbers = #tpu.dot_dimension_numbers<[1], [0], [0], [1], [0, 0, 1, 1], [], []>} : vector<300x128xf32>, vector<128x512xf32>, vector<300x512xf32> -> vector<300x512xf32>
    %c0_3 = arith.constant 0 : index
    %c0_4 = arith.constant 0 : index
    %3 = vector.load %arg2[%c0_3, %c0_4] : memref<1x512xf32, #tpu.memory_space<vmem>>, vector<1x512xf32>
    %4 = vector.broadcast %3 : vector<1x512xf32> to vector<300x512xf32>
    %5 = arith.addf %2, %4 : vector<300x512xf32>
    %cst_5 = arith.constant 0.000000e+00 : f32
    %6 = vector.broadcast %cst_5 : f32 to vector<300x512xf32>
    %7 = arith.maximumf %5, %6 : vector<300x512xf32>
    %c0_6 = arith.constant 0 : index
    %c0_7 = arith.constant 0 : index
    %8 = vector.load %arg3[%c0_6, %c0_7] : memref<300x512xf32, #tpu.memory_space<vmem>>, vector<300x512xf32>
    tpu.vector_store %arg3[%c0_6, %c0_7], %7 {strides = array<i32>} : memref<300x512xf32, #tpu.memory_space<vmem>>, vector<300x512xf32>,
    return
  }
}

</mosaic_0001>

<bundles_post_ra>
// kernel: tpu_custom_call.1
= control target key start
LH: loop header
LB: loop body
LE: loop exit
PB: predicated region body
PF: predicated region fallthrough
CT: control target
= control target key end

     0   :  { %8 = vsyncpa [#allocation3], 0  ;;  %s1336_s0 = inlined_call_operand.hbm [shape: f32[300,128], index: 0, kind: input, shape index: {}]   ;;  %s1337_s1 = inlined_call_operand.hbm [shape: f32[128,512], index: 1, kind: input, shape index: {}]   ;;  %s1338_s2 = inlined_call_operand.hbm [shape: f32[1,512], index: 2, kind: input, shape index: {}]   ;;  %s1339_s3 = inlined_call_operand.hbm [shape: f32[300,512], index: 3, kind: output, shape index: {}]  }
   0x1   :  { %9 = vsyncpa [#allocation6], 0  ;;  %s28_s14 = sshll.u32 %s1337_s1, 4  ;;  %s29_s14 = int_to_ptr.hbm [resolvable:$true] %s28_s14 }
   0x2   :  { %10 = vsyncpa [#allocation4], 0  ;;  %s1130_s15 = smov [#allocation5]   ;;  %s15_s19 = sshll.u32 %s1336_s0, 4  ;;  %s16_s19 = int_to_ptr.hbm [resolvable:$true] %s15_s19 }
   0x3   :  { %s30_s16 = sshll.u32 %s1130_s15, 4  ;;  %s1131_s20 = smov 512   ;;  %s31_s16 = int_to_ptr.vmem [resolvable:$true] %s30_s16 }
   0x4   :  { %s1132_s21 = smov 32   ;;  %s1133_s22 = smov [#allocation2]  }
   0x5   :  { %36 = dma.hbm_to_vmem [thread:$0]  %s29_s14, 8192, %s31_s16, [#allocation6], %s1131_s20, %s1131_s20, %s1132_s21  }
   0x6   :  { %s17_s23 = sshll.u32 %s1133_s22, 4  ;;  %s1134_s1 = smov 128   ;;  %s18_s23 = int_to_ptr.vmem [resolvable:$true] %s17_s23 }
   0x7   :  { %s1135_s24 = smov 8   ;;  %s42_s27 = sshll.u32 %s1338_s2, 4  ;;  %s43_s27 = int_to_ptr.hbm [resolvable:$true] %s42_s27 }
   0x8   :  { %23 = dma.hbm_to_vmem [thread:$0]  %s16_s19, 4864, %s18_s23, [#allocation3], %s1134_s1, %s1134_s1, %s1135_s24  }
   0x9   :  { %s1136_s28 = smov [#allocation7]  }
   0xa   :  { %s44_s0 = sshll.u32 %s1136_s28, 4  ;;  %s45_s0 = int_to_ptr.vmem [resolvable:$true] %s44_s0 }
   0xb   :  { %47 = dma.hbm_to_vmem [thread:$0]  %s43_s27, 64, %s45_s0, [#allocation6]  }
   0xc   :  { %1124 = dma.done.wait [#allocation3], 4864  }
   0xd   :  { %1125 = vsyncadd [#allocation3], 4294962432 }
   0xe   :  { %1126 = dma.done.wait [#allocation6], 8256  }
   0xf   :  { %1127 = vsyncadd [#allocation6], 4294959040  ;;  %v160_v0 = vld [vmem:[#allocation5 + $0x1f0] sm:$0xff]  ;;  %v161_v1 = vld [vmem:[#allocation5 + $0x1f8] sm:$0xff]  ;;  %s1137_s2 = smov [#allocation8]   ;;  %s1006_s5 = sshll.u32 %s1339_s3, 4  ;;  %s1007_s5 = int_to_ptr.hbm [resolvable:$true] %s1006_s5 }
  0x10   :  { %v156_v2 = vld [vmem:[#allocation5 + $0x1d0] sm:$0xff]  ;;  %434 = vmatpush.msra.mxu2 %v160_v0  ;;  %565 = vmatpush.msra.mxu3 %v161_v1  ;;  %v157_v3 = vld [vmem:[#allocation5 + $0x1d8] sm:$0xff]  ;;  %v158_v6 = vld [vmem:[#allocation5 + $0x1e0] sm:$0xff]  ;;  %s1004_s29 = sshll.u32 %s1137_s2, 4  ;;  %s1005_s29 = int_to_ptr.vmem [resolvable:$true] %s1004_s29 }
  0x11   :  { %v152_v4 = vld [vmem:[#allocation5 + $0x1b0] sm:$0xff]  ;;  %v153_v5 = vld [vmem:[#allocation5 + $0x1b8] sm:$0xff]  ;;  %v159_v7 = vld [vmem:[#allocation5 + $0x1e8] sm:$0xff]  ;;  %172 = vmatpush.msra.mxu0 %v158_v6 }
  0x12   :  { %435 = vmatpush.msra.mxu2 %v156_v2  ;;  %566 = vmatpush.msra.mxu3 %v157_v3  ;;  %v154_v8 = vld [vmem:[#allocation5 + $0x1c0] sm:$0xff]  ;;  %v155_v9 = vld [vmem:[#allocation5 + $0x1c8] sm:$0xff]  ;;  %v148_v10 = vld [vmem:[#allocation5 + $0x190] sm:$0xff] }
  0x13   :  { %303 = vmatpush.msra.mxu1 %v159_v7  ;;  %v149_v11 = vld [vmem:[#allocation5 + $0x198] sm:$0xff]  ;;  %v150_v12 = vld [vmem:[#allocation5 + $0x1a0] sm:$0xff]  ;;  %v151_v13 = vld [vmem:[#allocation5 + $0x1a8] sm:$0xff]  ;;  %173 = vmatpush.msra.mxu0 %v154_v8 }
  0x14   :  { %436 = vmatpush.msra.mxu2 %v152_v4  ;;  %567 = vmatpush.msra.mxu3 %v153_v5  ;;  %v144_v14 = vld [vmem:[#allocation5 + $0x170] sm:$0xff]  ;;  %v145_v15 = vld [vmem:[#allocation5 + $0x178] sm:$0xff]  ;;  %v146_v16 = vld [vmem:[#allocation5 + $0x180] sm:$0xff] }
  0x15   :  { %304 = vmatpush.msra.mxu1 %v155_v9  ;;  %v147_v17 = vld [vmem:[#allocation5 + $0x188] sm:$0xff]  ;;  %174 = vmatpush.msra.mxu0 %v150_v12  ;;  %v140_v18 = vld [vmem:[#allocation5 + $0x150] sm:$0xff]  ;;  %v141_v19 = vld [vmem:[#allocation5 + $0x158] sm:$0xff] }
  0x16   :  { %437 = vmatpush.msra.mxu2 %v148_v10  ;;  %568 = vmatpush.msra.mxu3 %v149_v11  ;;  %v142_v20 = vld [vmem:[#allocation5 + $0x160] sm:$0xff]  ;;  %v143_v21 = vld [vmem:[#allocation5 + $0x168] sm:$0xff]  ;;  %v136_v22 = vld [vmem:[#allocation5 + $0x130] sm:$0xff] }
  0x17   :  { %305 = vmatpush.msra.mxu1 %v151_v13  ;;  %175 = vmatpush.msra.mxu0 %v146_v16  ;;  %v137_v23 = vld [vmem:[#allocation5 + $0x138] sm:$0xff]  ;;  %v138_v24 = vld [vmem:[#allocation5 + $0x140] sm:$0xff]  ;;  %v139_v25 = vld [vmem:[#allocation5 + $0x148] sm:$0xff] }
  0x18   :  { %438 = vmatpush.msra.mxu2 %v144_v14  ;;  %569 = vmatpush.msra.mxu3 %v145_v15  ;;  %v132_v26 = vld [vmem:[#allocation5 + $0x110] sm:$0xff]  ;;  %v133_v27 = vld [vmem:[#allocation5 + $0x118] sm:$0xff]  ;;  %v134_v28 = vld [vmem:[#allocation5 + $0x120] sm:$0xff] }
  0x19   :  { %306 = vmatpush.msra.mxu1 %v147_v17  ;;  %176 = vmatpush.msra.mxu0 %v142_v20  ;;  %v135_v29 = vld [vmem:[#allocation5 + $0x128] sm:$0xff]  ;;  %v128_v30 = vld [vmem:[#allocation5 + $0xf0] sm:$0xff]  ;;  %v129_v31 = vld [vmem:[#allocation5 + $0xf8] sm:$0xff] }
  0x1a   :  { %439 = vmatpush.msra.mxu2 %v140_v18  ;;  %570 = vmatpush.msra.mxu3 %v141_v19  ;;  %v130_v32 = vld [vmem:[#allocation5 + $0x100] sm:$0xff]  ;;  %v131_v33 = vld [vmem:[#allocation5 + $0x108] sm:$0xff]  ;;  %v124_v34 = vld [vmem:[#allocation5 + $0xd0] sm:$0xff] }
  0x1b   :  { %307 = vmatpush.msra.mxu1 %v143_v21  ;;  %177 = vmatpush.msra.mxu0 %v138_v24  ;;  %v125_v35 = vld [vmem:[#allocation5 + $0xd8] sm:$0xff]  ;;  %v126_v36 = vld [vmem:[#allocation5 + $0xe0] sm:$0xff]  ;;  %v127_v37 = vld [vmem:[#allocation5 + $0xe8] sm:$0xff] }
  0x1c   :  { %440 = vmatpush.msra.mxu2 %v136_v22  ;;  %571 = vmatpush.msra.mxu3 %v137_v23  ;;  %v120_v38 = vld [vmem:[#allocation5 + $0xb0] sm:$0xff]  ;;  %v121_v39 = vld [vmem:[#allocation5 + $0xb8] sm:$0xff]  ;;  %v122_v40 = vld [vmem:[#allocation5 + $0xc0] sm:$0xff] }
  0x1d   :  { %308 = vmatpush.msra.mxu1 %v139_v25  ;;  %178 = vmatpush.msra.mxu0 %v134_v28  ;;  %v123_v41 = vld [vmem:[#allocation5 + $0xc8] sm:$0xff]  ;;  %v116_v42 = vld [vmem:[#allocation5 + $0x90] sm:$0xff]  ;;  %v117_v43 = vld [vmem:[#allocation5 + $0x98] sm:$0xff] }
  0x1e   :  { %441 = vmatpush.msra.mxu2 %v132_v26  ;;  %572 = vmatpush.msra.mxu3 %v133_v27  ;;  %v118_v44 = vld [vmem:[#allocation5 + $0xa0] sm:$0xff]  ;;  %v119_v45 = vld [vmem:[#allocation5 + $0xa8] sm:$0xff]  ;;  %v112_v46 = vld [vmem:[#allocation5 + $0x70] sm:$0xff] }
  0x1f   :  { %309 = vmatpush.msra.mxu1 %v135_v29  ;;  %179 = vmatpush.msra.mxu0 %v130_v32  ;;  %v113_v47 = vld [vmem:[#allocation5 + $0x78] sm:$0xff]  ;;  %v114_v48 = vld [vmem:[#allocation5 + $0x80] sm:$0xff]  ;;  %v115_v49 = vld [vmem:[#allocation5 + $0x88] sm:$0xff] }
  0x20   :  { %442 = vmatpush.msra.mxu2 %v128_v30  ;;  %573 = vmatpush.msra.mxu3 %v129_v31  ;;  %v108_v50 = vld [vmem:[#allocation5 + $0x50] sm:$0xff]  ;;  %v109_v51 = vld [vmem:[#allocation5 + $0x58] sm:$0xff]  ;;  %v110_v52 = vld [vmem:[#allocation5 + $0x60] sm:$0xff] }
  0x21   :  { %310 = vmatpush.msra.mxu1 %v131_v33  ;;  %180 = vmatpush.msra.mxu0 %v126_v36  ;;  %v111_v53 = vld [vmem:[#allocation5 + $0x68] sm:$0xff]  ;;  %v104_v54 = vld [vmem:[#allocation5 + $0x30] sm:$0xff]  ;;  %v105_v55 = vld [vmem:[#allocation5 + $0x38] sm:$0xff] }
  0x22   :  { %443 = vmatpush.msra.mxu2 %v124_v34  ;;  %574 = vmatpush.msra.mxu3 %v125_v35  ;;  %v106_v56 = vld [vmem:[#allocation5 + $0x40] sm:$0xff]  ;;  %v107_v57 = vld [vmem:[#allocation5 + $0x48] sm:$0xff]  ;;  %v100_v58 = vld [vmem:[#allocation5 + $0x10] sm:$0xff] }
  0x23   :  { %311 = vmatpush.msra.mxu1 %v127_v37  ;;  %181 = vmatpush.msra.mxu0 %v122_v40  ;;  %v101_v59 = vld [vmem:[#allocation5 + $0x18] sm:$0xff]  ;;  %v60_v60 = vld [vmem:[#allocation2] sm:$0xff]  ;;  %v102_v61 = vld [vmem:[#allocation5 + $0x20] sm:$0xff] }
  0x24   :  { %444 = vmatpush.msra.mxu2 %v120_v38  ;;  %575 = vmatpush.msra.mxu3 %v121_v39  ;;  %v103_v62 = vld [vmem:[#allocation5 + $0x28] sm:$0xff]  ;;  %v98_v63 = vld [vmem:[#allocation5] sm:$0xff]  ;;  %v61_v1 = vld [vmem:[#allocation2 + $0x8] sm:$0xff] }
  0x25   :  { %312 = vmatpush.msra.mxu1 %v123_v41  ;;  %182 = vmatpush.msra.mxu0 %v118_v44  ;;  %v99_v0 = vld [vmem:[#allocation5 + $0x8] sm:$0xff]  ;;  %v62_v2 = vld [vmem:[#allocation2 + $0x10] sm:$0xff]  ;;  %v64_v4 = vld [vmem:[#allocation2 + $0x20] sm:$0xff] }
  0x26   :  { %445 = vmatpush.msra.mxu2 %v116_v42  ;;  %576 = vmatpush.msra.mxu3 %v117_v43  ;;  %v63_v3 = vld [vmem:[#allocation2 + $0x18] sm:$0xff]  ;;  %v65_v5 = vld [vmem:[#allocation2 + $0x28] sm:$0xff]  ;;  %v66_v6 = vld [vmem:[#allocation2 + $0x30] sm:$0xff] }
  0x27   :  { %313 = vmatpush.msra.mxu1 %v119_v45  ;;  %183 = vmatpush.msra.mxu0 %v114_v48  ;;  %v67_v7 = vld [vmem:[#allocation2 + $0x38] sm:$0xff]  ;;  %v68_v8 = vld [vmem:[#allocation2 + $0x40] sm:$0xff]  ;;  %v69_v9 = vld [vmem:[#allocation2 + $0x48] sm:$0xff] }
  0x28   :  { %446 = vmatpush.msra.mxu2 %v112_v46  ;;  %577 = vmatpush.msra.mxu3 %v113_v47  ;;  %v70_v10 = vld [vmem:[#allocation2 + $0x50] sm:$0xff]  ;;  %v71_v11 = vld [vmem:[#allocation2 + $0x58] sm:$0xff]  ;;  %v72_v12 = vld [vmem:[#allocation2 + $0x60] sm:$0xff] }
  0x29   :  { %314 = vmatpush.msra.mxu1 %v115_v49  ;;  %184 = vmatpush.msra.mxu0 %v110_v52  ;;  %v73_v13 = vld [vmem:[#allocation2 + $0x68] sm:$0xff]  ;;  %v74_v14 = vld [vmem:[#allocation2 + $0x70] sm:$0xff]  ;;  %v75_v15 = vld [vmem:[#allocation2 + $0x78] sm:$0xff] }
  0x2a   :  { %447 = vmatpush.msra.mxu2 %v108_v50  ;;  %578 = vmatpush.msra.mxu3 %v109_v51  ;;  %v162_v16 = vld [vmem:[#allocation7] sm:$0xf]  ;;  %v76_v17 = vld [vmem:[#allocation2 + $0x80] sm:$0xff]  ;;  %v77_v32 = vld [vmem:[#allocation2 + $0x88] sm:$0xff] }
  0x2b   :  { %315 = vmatpush.msra.mxu1 %v111_v53  ;;  %185 = vmatpush.msra.mxu0 %v106_v56  ;;  %v1170_v18 = vperm.slane %v162_v16, 0  ;;  %v1172_v19 = vperm.slane %v162_v16, 1  ;;  %v1174_v20 = vperm.slane %v162_v16, 2  ;;  %v1176_v21 = vperm.slane %v162_v16, 3  ;;  %v78_v45 = vld [vmem:[#allocation2 + $0x90] sm:$0xff] }
  0x2c   :  { %448 = vmatpush.msra.mxu2 %v104_v54  ;;  %579 = vmatpush.msra.mxu3 %v105_v55 }
  0x2d   :  { %316 = vmatpush.msra.mxu1 %v107_v57  ;;  %186 = vmatpush.msra.mxu0 %v102_v61 }
  0x2e   :  { %449 = vmatpush.msra.mxu2 %v100_v58  ;;  %580 = vmatpush.msra.mxu3 %v101_v59  ;;  %v79_v58 = vld [vmem:[#allocation2 + $0x98] sm:$0xff] }
  0x2f   :  { %450 = vmatmul.f32.vlgmr.msra.gmra.mxu2 %v60_v60  ;;  %581 = vmatmul.f32.vlgmr.msra.gmra.mxu3 %v60_v60 }
  0x30   :  { %317 = vmatpush.msra.mxu1 %v103_v62  ;;  %187 = vmatpush.msra.mxu0 %v98_v63 }
  0x31   :  { %188 = vmatmul.f32.vlgmr.msra.gmra.mxu0 %v60_v60 }
  0x32   :  { %318 = vmatpush.msra.mxu1 %v99_v0 }
  0x33   :  { %319 = vmatmul.f32.vlgmr.msra.gmra.mxu1 %v60_v60 }
  0x37   :  { %453 = vmatmul.f32.gmra.mxu2 %v61_v1  ;;  %584 = vmatmul.f32.gmra.mxu3 %v61_v1 }
  0x39   :  { %191 = vmatmul.f32.gmra.mxu0 %v61_v1 }
  0x3b   :  { %322 = vmatmul.f32.gmra.mxu1 %v61_v1 }
  0x3f   :  { %456 = vmatmul.f32.gmra.mxu2 %v62_v2  ;;  %587 = vmatmul.f32.gmra.mxu3 %v62_v2 }
  0x41   :  { %194 = vmatmul.f32.gmra.mxu0 %v62_v2 }
  0x43   :  { %325 = vmatmul.f32.gmra.mxu1 %v62_v2 }
  0x47   :  { %459 = vmatmul.f32.gmra.mxu2 %v63_v3  ;;  %590 = vmatmul.f32.gmra.mxu3 %v63_v3 }
  0x49   :  { %197 = vmatmul.f32.gmra.mxu0 %v63_v3 }
  0x4b   :  { %328 = vmatmul.f32.gmra.mxu1 %v63_v3 }
  0x4f   :  { %462 = vmatmul.f32.gmra.mxu2 %v64_v4  ;;  %593 = vmatmul.f32.gmra.mxu3 %v64_v4 }
  0x51   :  { %200 = vmatmul.f32.gmra.mxu0 %v64_v4 }
  0x53   :  { %331 = vmatmul.f32.gmra.mxu1 %v64_v4 }
  0x57   :  { %465 = vmatmul.f32.gmra.mxu2 %v65_v5  ;;  %596 = vmatmul.f32.gmra.mxu3 %v65_v5 }
  0x59   :  { %203 = vmatmul.f32.gmra.mxu0 %v65_v5 }
  0x5b   :  { %334 = vmatmul.f32.gmra.mxu1 %v65_v5 }
  0x5f   :  { %468 = vmatmul.f32.gmra.mxu2 %v66_v6  ;;  %599 = vmatmul.f32.gmra.mxu3 %v66_v6 }
  0x61   :  { %206 = vmatmul.f32.gmra.mxu0 %v66_v6 }
  0x63   :  { %337 = vmatmul.f32.gmra.mxu1 %v66_v6 }
  0x67   :  { %471 = vmatmul.f32.gmra.mxu2 %v67_v7  ;;  %602 = vmatmul.f32.gmra.mxu3 %v67_v7 }
  0x69   :  { %209 = vmatmul.f32.gmra.mxu0 %v67_v7 }
  0x6b   :  { %340 = vmatmul.f32.gmra.mxu1 %v67_v7  ;;  %v80_v7 = vld [vmem:[#allocation2 + $0xa0] sm:$0xff] }
  0x6f   :  { %474 = vmatmul.f32.gmra.mxu2 %v68_v8  ;;  %605 = vmatmul.f32.gmra.mxu3 %v68_v8 }
  0x71   :  { %212 = vmatmul.f32.gmra.mxu0 %v68_v8 }
  0x73   :  { %343 = vmatmul.f32.gmra.mxu1 %v68_v8 }
  0x77   :  { %477 = vmatmul.f32.gmra.mxu2 %v69_v9  ;;  %608 = vmatmul.f32.gmra.mxu3 %v69_v9 }
  0x79   :  { %215 = vmatmul.f32.gmra.mxu0 %v69_v9 }
  0x7b   :  { %346 = vmatmul.f32.gmra.mxu1 %v69_v9 }
  0x7f   :  { %480 = vmatmul.f32.gmra.mxu2 %v70_v10  ;;  %611 = vmatmul.f32.gmra.mxu3 %v70_v10 }
  0x81   :  { %218 = vmatmul.f32.gmra.mxu0 %v70_v10 }
  0x83   :  { %349 = vmatmul.f32.gmra.mxu1 %v70_v10 }
  0x87   :  { %483 = vmatmul.f32.gmra.mxu2 %v71_v11  ;;  %614 = vmatmul.f32.gmra.mxu3 %v71_v11 }
  0x89   :  { %221 = vmatmul.f32.gmra.mxu0 %v71_v11 }
  0x8b   :  { %352 = vmatmul.f32.gmra.mxu1 %v71_v11 }
  0x8f   :  { %486 = vmatmul.f32.gmra.mxu2 %v72_v12  ;;  %617 = vmatmul.f32.gmra.mxu3 %v72_v12 }
  0x91   :  { %224 = vmatmul.f32.gmra.mxu0 %v72_v12 }
  0x93   :  { %355 = vmatmul.f32.gmra.mxu1 %v72_v12 }
  0x97   :  { %489 = vmatmul.f32.gmra.mxu2 %v73_v13  ;;  %620 = vmatmul.f32.gmra.mxu3 %v73_v13 }
  0x99   :  { %227 = vmatmul.f32.gmra.mxu0 %v73_v13 }
  0x9b   :  { %358 = vmatmul.f32.gmra.mxu1 %v73_v13 }
  0x9f   :  { %492 = vmatmul.f32.gmra.mxu2 %v74_v14  ;;  %623 = vmatmul.f32.gmra.mxu3 %v74_v14 }
  0xa1   :  { %230 = vmatmul.f32.gmra.mxu0 %v74_v14 }
  0xa3   :  { %361 = vmatmul.f32.gmra.mxu1 %v74_v14 }
  0xa7   :  { %495 = vmatmul.f32.gmra.mxu2 %v75_v15  ;;  %626 = vmatmul.f32.gmra.mxu3 %v75_v15 }
  0xa9   :  { %233 = vmatmul.f32.gmra.mxu0 %v75_v15 }
  0xab   :  { %364 = vmatmul.f32.gmra.mxu1 %v75_v15 }
  0xae   :  { %v189_v22 = vpop.f32.mrf.mxu0 }
  0xaf   :  { %498 = vmatmul.f32.gmra.mxu2 %v76_v17  ;;  %629 = vmatmul.f32.gmra.mxu3 %v76_v17  ;;  %v190_v24 = vadd.f32 %v189_v22, %v1170_v18 }
  0xb0   :  { %v320_v23 = vpop.f32.mrf.mxu1 }
  0xb1   :  { %v321_v25 = vadd.f32 %v320_v23, %v1172_v19  ;;  %v696_v28 = vmax.f32 %v190_v24, 0.0  ;;  %236 = vmatmul.f32.gmra.mxu0 %v76_v17  ;;  %v81_v24 = vld [vmem:[#allocation2 + $0xa8] sm:$0xff] }
  0xb2   :  { %v451_v26 = vpop.f32.mrf.mxu2  ;;  %v582_v27 = vpop.f32.mrf.mxu3 }
  0xb3   :  { %v697_v29 = vmax.f32 %v321_v25, 0.0  ;;  %v452_v30 = vadd.f32 %v451_v26, %v1174_v20  ;;  %v583_v31 = vadd.f32 %v582_v27, %v1176_v21  ;;  %367 = vmatmul.f32.gmra.mxu1 %v76_v17  ;;  %848 = vst [vmem:[#allocation8] sm:$0xff] %v696_v28 }
  0xb5   :  { %v698_v33 = vmax.f32 %v452_v30, 0.0  ;;  %v699_v34 = vmax.f32 %v583_v31, 0.0  ;;  %849 = vst [vmem:[#allocation8 + $0x8] sm:$0xff] %v697_v29 }
  0xb6   :  { %v192_v35 = vpop.f32.mrf.mxu0 }
  0xb7   :  { %850 = vst [vmem:[#allocation8 + $0x10] sm:$0xff] %v698_v33  ;;  %501 = vmatmul.f32.gmra.mxu2 %v77_v32  ;;  %632 = vmatmul.f32.gmra.mxu3 %v77_v32  ;;  %v193_v37 = vadd.f32 %v192_v35, %v1170_v18 }
  0xb8   :  { %851 = vst [vmem:[#allocation8 + $0x18] sm:$0xff] %v699_v34  ;;  %v323_v36 = vpop.f32.mrf.mxu1 }
  0xb9   :  { %v324_v38 = vadd.f32 %v323_v36, %v1172_v19  ;;  %v700_v41 = vmax.f32 %v193_v37, 0.0  ;;  %239 = vmatmul.f32.gmra.mxu0 %v77_v32  ;;  %v82_v37 = vld [vmem:[#allocation2 + $0xb0] sm:$0xff] }
  0xba   :  { %v454_v39 = vpop.f32.mrf.mxu2  ;;  %v585_v40 = vpop.f32.mrf.mxu3 }
  0xbb   :  { %v701_v42 = vmax.f32 %v324_v38, 0.0  ;;  %v455_v43 = vadd.f32 %v454_v39, %v1174_v20  ;;  %v586_v44 = vadd.f32 %v585_v40, %v1176_v21  ;;  %370 = vmatmul.f32.gmra.mxu1 %v77_v32  ;;  %852 = vst [vmem:[#allocation8 + $0x20] sm:$0xff] %v700_v41 }
  0xbd   :  { %v702_v46 = vmax.f32 %v455_v43, 0.0  ;;  %v703_v47 = vmax.f32 %v586_v44, 0.0  ;;  %853 = vst [vmem:[#allocation8 + $0x28] sm:$0xff] %v701_v42 }
  0xbe   :  { %v195_v48 = vpop.f32.mrf.mxu0 }
  0xbf   :  { %854 = vst [vmem:[#allocation8 + $0x30] sm:$0xff] %v702_v46  ;;  %504 = vmatmul.f32.gmra.mxu2 %v78_v45  ;;  %635 = vmatmul.f32.gmra.mxu3 %v78_v45  ;;  %v196_v50 = vadd.f32 %v195_v48, %v1170_v18 }
  0xc0   :  { %855 = vst [vmem:[#allocation8 + $0x38] sm:$0xff] %v703_v47  ;;  %v326_v49 = vpop.f32.mrf.mxu1 }
  0xc1   :  { %v327_v51 = vadd.f32 %v326_v49, %v1172_v19  ;;  %v704_v54 = vmax.f32 %v196_v50, 0.0  ;;  %242 = vmatmul.f32.gmra.mxu0 %v78_v45  ;;  %v83_v50 = vld [vmem:[#allocation2 + $0xb8] sm:$0xff] }
  0xc2   :  { %v457_v52 = vpop.f32.mrf.mxu2  ;;  %v588_v53 = vpop.f32.mrf.mxu3 }
  0xc3   :  { %v705_v55 = vmax.f32 %v327_v51, 0.0  ;;  %v458_v56 = vadd.f32 %v457_v52, %v1174_v20  ;;  %v589_v57 = vadd.f32 %v588_v53, %v1176_v21  ;;  %373 = vmatmul.f32.gmra.mxu1 %v78_v45  ;;  %856 = vst [vmem:[#allocation8 + $0x40] sm:$0xff] %v704_v54 }
  0xc5   :  { %v706_v59 = vmax.f32 %v458_v56, 0.0  ;;  %v707_v60 = vmax.f32 %v589_v57, 0.0  ;;  %857 = vst [vmem:[#allocation8 + $0x48] sm:$0xff] %v705_v55 }
  0xc6   :  { %v198_v61 = vpop.f32.mrf.mxu0 }
  0xc7   :  { %858 = vst [vmem:[#allocation8 + $0x50] sm:$0xff] %v706_v59  ;;  %507 = vmatmul.f32.gmra.mxu2 %v79_v58  ;;  %638 = vmatmul.f32.gmra.mxu3 %v79_v58  ;;  %v199_v63 = vadd.f32 %v198_v61, %v1170_v18 }
  0xc8   :  { %859 = vst [vmem:[#allocation8 + $0x58] sm:$0xff] %v707_v60  ;;  %v329_v62 = vpop.f32.mrf.mxu1 }
  0xc9   :  { %v330_v0 = vadd.f32 %v329_v62, %v1172_v19  ;;  %v708_v3 = vmax.f32 %v199_v63, 0.0  ;;  %245 = vmatmul.f32.gmra.mxu0 %v79_v58  ;;  %v84_v63 = vld [vmem:[#allocation2 + $0xc0] sm:$0xff] }
  0xca   :  { %v460_v1 = vpop.f32.mrf.mxu2  ;;  %v591_v2 = vpop.f32.mrf.mxu3 }
  0xcb   :  { %v709_v4 = vmax.f32 %v330_v0, 0.0  ;;  %v461_v5 = vadd.f32 %v460_v1, %v1174_v20  ;;  %v592_v6 = vadd.f32 %v591_v2, %v1176_v21  ;;  %376 = vmatmul.f32.gmra.mxu1 %v79_v58  ;;  %860 = vst [vmem:[#allocation8 + $0x60] sm:$0xff] %v708_v3 }
  0xcd   :  { %v710_v8 = vmax.f32 %v461_v5, 0.0  ;;  %v711_v9 = vmax.f32 %v592_v6, 0.0  ;;  %861 = vst [vmem:[#allocation8 + $0x68] sm:$0xff] %v709_v4 }
  0xce   :  { %v201_v10 = vpop.f32.mrf.mxu0 }
  0xcf   :  { %862 = vst [vmem:[#allocation8 + $0x70] sm:$0xff] %v710_v8  ;;  %510 = vmatmul.f32.gmra.mxu2 %v80_v7  ;;  %641 = vmatmul.f32.gmra.mxu3 %v80_v7  ;;  %v202_v12 = vadd.f32 %v201_v10, %v1170_v18 }
  0xd0   :  { %863 = vst [vmem:[#allocation8 + $0x78] sm:$0xff] %v711_v9  ;;  %v332_v11 = vpop.f32.mrf.mxu1 }
  0xd1   :  { %v333_v13 = vadd.f32 %v332_v11, %v1172_v19  ;;  %v712_v16 = vmax.f32 %v202_v12, 0.0  ;;  %248 = vmatmul.f32.gmra.mxu0 %v80_v7  ;;  %v85_v12 = vld [vmem:[#allocation2 + $0xc8] sm:$0xff] }
  0xd2   :  { %v463_v14 = vpop.f32.mrf.mxu2  ;;  %v594_v15 = vpop.f32.mrf.mxu3 }
  0xd3   :  { %v713_v17 = vmax.f32 %v333_v13, 0.0  ;;  %v464_v22 = vadd.f32 %v463_v14, %v1174_v20  ;;  %v595_v23 = vadd.f32 %v594_v15, %v1176_v21  ;;  %379 = vmatmul.f32.gmra.mxu1 %v80_v7  ;;  %864 = vst [vmem:[#allocation8 + $0x80] sm:$0xff] %v712_v16 }
  0xd5   :  { %v714_v25 = vmax.f32 %v464_v22, 0.0  ;;  %v715_v26 = vmax.f32 %v595_v23, 0.0  ;;  %865 = vst [vmem:[#allocation8 + $0x88] sm:$0xff] %v713_v17 }
  0xd6   :  { %v204_v27 = vpop.f32.mrf.mxu0 }
  0xd7   :  { %866 = vst [vmem:[#allocation8 + $0x90] sm:$0xff] %v714_v25  ;;  %513 = vmatmul.f32.gmra.mxu2 %v81_v24  ;;  %644 = vmatmul.f32.gmra.mxu3 %v81_v24  ;;  %v205_v29 = vadd.f32 %v204_v27, %v1170_v18 }
  0xd8   :  { %867 = vst [vmem:[#allocation8 + $0x98] sm:$0xff] %v715_v26  ;;  %v335_v28 = vpop.f32.mrf.mxu1 }
  0xd9   :  { %v336_v30 = vadd.f32 %v335_v28, %v1172_v19  ;;  %v716_v33 = vmax.f32 %v205_v29, 0.0  ;;  %251 = vmatmul.f32.gmra.mxu0 %v81_v24  ;;  %v86_v29 = vld [vmem:[#allocation2 + $0xd0] sm:$0xff] }
  0xda   :  { %v466_v31 = vpop.f32.mrf.mxu2  ;;  %v597_v32 = vpop.f32.mrf.mxu3 }
  0xdb   :  { %v717_v34 = vmax.f32 %v336_v30, 0.0  ;;  %v467_v35 = vadd.f32 %v466_v31, %v1174_v20  ;;  %v598_v36 = vadd.f32 %v597_v32, %v1176_v21  ;;  %382 = vmatmul.f32.gmra.mxu1 %v81_v24  ;;  %868 = vst [vmem:[#allocation8 + $0xa0] sm:$0xff] %v716_v33 }
  0xdd   :  { %v718_v38 = vmax.f32 %v467_v35, 0.0  ;;  %v719_v39 = vmax.f32 %v598_v36, 0.0  ;;  %869 = vst [vmem:[#allocation8 + $0xa8] sm:$0xff] %v717_v34 }
  0xde   :  { %v207_v40 = vpop.f32.mrf.mxu0 }
  0xdf   :  { %870 = vst [vmem:[#allocation8 + $0xb0] sm:$0xff] %v718_v38  ;;  %516 = vmatmul.f32.gmra.mxu2 %v82_v37  ;;  %647 = vmatmul.f32.gmra.mxu3 %v82_v37  ;;  %v208_v42 = vadd.f32 %v207_v40, %v1170_v18 }
  0xe0   :  { %871 = vst [vmem:[#allocation8 + $0xb8] sm:$0xff] %v719_v39  ;;  %v338_v41 = vpop.f32.mrf.mxu1 }
  0xe1   :  { %v339_v43 = vadd.f32 %v338_v41, %v1172_v19  ;;  %v720_v46 = vmax.f32 %v208_v42, 0.0  ;;  %254 = vmatmul.f32.gmra.mxu0 %v82_v37  ;;  %v87_v42 = vld [vmem:[#allocation2 + $0xd8] sm:$0xff] }
  0xe2   :  { %v469_v44 = vpop.f32.mrf.mxu2  ;;  %v600_v45 = vpop.f32.mrf.mxu3 }
  0xe3   :  { %v721_v47 = vmax.f32 %v339_v43, 0.0  ;;  %v470_v48 = vadd.f32 %v469_v44, %v1174_v20  ;;  %v601_v49 = vadd.f32 %v600_v45, %v1176_v21  ;;  %385 = vmatmul.f32.gmra.mxu1 %v82_v37  ;;  %872 = vst [vmem:[#allocation8 + $0xc0] sm:$0xff] %v720_v46 }
  0xe5   :  { %v722_v51 = vmax.f32 %v470_v48, 0.0  ;;  %v723_v52 = vmax.f32 %v601_v49, 0.0  ;;  %873 = vst [vmem:[#allocation8 + $0xc8] sm:$0xff] %v721_v47 }
  0xe6   :  { %v210_v53 = vpop.f32.mrf.mxu0 }
  0xe7   :  { %874 = vst [vmem:[#allocation8 + $0xd0] sm:$0xff] %v722_v51  ;;  %519 = vmatmul.f32.gmra.mxu2 %v83_v50  ;;  %650 = vmatmul.f32.gmra.mxu3 %v83_v50  ;;  %v211_v55 = vadd.f32 %v210_v53, %v1170_v18 }
  0xe8   :  { %875 = vst [vmem:[#allocation8 + $0xd8] sm:$0xff] %v723_v52  ;;  %v341_v54 = vpop.f32.mrf.mxu1 }
  0xe9   :  { %v342_v56 = vadd.f32 %v341_v54, %v1172_v19  ;;  %v724_v59 = vmax.f32 %v211_v55, 0.0  ;;  %257 = vmatmul.f32.gmra.mxu0 %v83_v50  ;;  %v88_v55 = vld [vmem:[#allocation2 + $0xe0] sm:$0xff] }
  0xea   :  { %v472_v57 = vpop.f32.mrf.mxu2  ;;  %v603_v58 = vpop.f32.mrf.mxu3 }
  0xeb   :  { %v725_v60 = vmax.f32 %v342_v56, 0.0  ;;  %v473_v61 = vadd.f32 %v472_v57, %v1174_v20  ;;  %v604_v62 = vadd.f32 %v603_v58, %v1176_v21  ;;  %388 = vmatmul.f32.gmra.mxu1 %v83_v50  ;;  %876 = vst [vmem:[#allocation8 + $0xe0] sm:$0xff] %v724_v59 }
  0xed   :  { %v726_v0 = vmax.f32 %v473_v61, 0.0  ;;  %v727_v1 = vmax.f32 %v604_v62, 0.0  ;;  %877 = vst [vmem:[#allocation8 + $0xe8] sm:$0xff] %v725_v60 }
  0xee   :  { %v213_v2 = vpop.f32.mrf.mxu0 }
  0xef   :  { %878 = vst [vmem:[#allocation8 + $0xf0] sm:$0xff] %v726_v0  ;;  %522 = vmatmul.f32.gmra.mxu2 %v84_v63  ;;  %653 = vmatmul.f32.gmra.mxu3 %v84_v63  ;;  %v214_v4 = vadd.f32 %v213_v2, %v1170_v18 }
  0xf0   :  { %879 = vst [vmem:[#allocation8 + $0xf8] sm:$0xff] %v727_v1  ;;  %v344_v3 = vpop.f32.mrf.mxu1 }
  0xf1   :  { %v345_v5 = vadd.f32 %v344_v3, %v1172_v19  ;;  %v728_v8 = vmax.f32 %v214_v4, 0.0  ;;  %260 = vmatmul.f32.gmra.mxu0 %v84_v63  ;;  %v89_v4 = vld [vmem:[#allocation2 + $0xe8] sm:$0xff] }
  0xf2   :  { %v475_v6 = vpop.f32.mrf.mxu2  ;;  %v606_v7 = vpop.f32.mrf.mxu3 }
  0xf3   :  { %v729_v9 = vmax.f32 %v345_v5, 0.0  ;;  %v476_v10 = vadd.f32 %v475_v6, %v1174_v20  ;;  %v607_v11 = vadd.f32 %v606_v7, %v1176_v21  ;;  %391 = vmatmul.f32.gmra.mxu1 %v84_v63  ;;  %880 = vst [vmem:[#allocation8 + $0x100] sm:$0xff] %v728_v8 }
  0xf5   :  { %v730_v13 = vmax.f32 %v476_v10, 0.0  ;;  %v731_v14 = vmax.f32 %v607_v11, 0.0  ;;  %881 = vst [vmem:[#allocation8 + $0x108] sm:$0xff] %v729_v9 }
  0xf6   :  { %v216_v15 = vpop.f32.mrf.mxu0 }
  0xf7   :  { %882 = vst [vmem:[#allocation8 + $0x110] sm:$0xff] %v730_v13  ;;  %525 = vmatmul.f32.gmra.mxu2 %v85_v12  ;;  %656 = vmatmul.f32.gmra.mxu3 %v85_v12  ;;  %v217_v17 = vadd.f32 %v216_v15, %v1170_v18 }
  0xf8   :  { %883 = vst [vmem:[#allocation8 + $0x118] sm:$0xff] %v731_v14  ;;  %v347_v16 = vpop.f32.mrf.mxu1 }
  0xf9   :  { %v348_v22 = vadd.f32 %v347_v16, %v1172_v19  ;;  %v732_v25 = vmax.f32 %v217_v17, 0.0  ;;  %263 = vmatmul.f32.gmra.mxu0 %v85_v12  ;;  %v90_v17 = vld [vmem:[#allocation2 + $0xf0] sm:$0xff] }
  0xfa   :  { %v478_v23 = vpop.f32.mrf.mxu2  ;;  %v609_v24 = vpop.f32.mrf.mxu3 }
  0xfb   :  { %v733_v26 = vmax.f32 %v348_v22, 0.0  ;;  %v479_v27 = vadd.f32 %v478_v23, %v1174_v20  ;;  %v610_v28 = vadd.f32 %v609_v24, %v1176_v21  ;;  %394 = vmatmul.f32.gmra.mxu1 %v85_v12  ;;  %884 = vst [vmem:[#allocation8 + $0x120] sm:$0xff] %v732_v25 }
  0xfd   :  { %v734_v30 = vmax.f32 %v479_v27, 0.0  ;;  %v735_v31 = vmax.f32 %v610_v28, 0.0  ;;  %885 = vst [vmem:[#allocation8 + $0x128] sm:$0xff] %v733_v26 }
  0xfe   :  { %v219_v32 = vpop.f32.mrf.mxu0 }
  0xff   :  { %886 = vst [vmem:[#allocation8 + $0x130] sm:$0xff] %v734_v30  ;;  %528 = vmatmul.f32.gmra.mxu2 %v86_v29  ;;  %659 = vmatmul.f32.gmra.mxu3 %v86_v29  ;;  %v220_v34 = vadd.f32 %v219_v32, %v1170_v18 }
 0x100   :  { %887 = vst [vmem:[#allocation8 + $0x138] sm:$0xff] %v735_v31  ;;  %v350_v33 = vpop.f32.mrf.mxu1 }
 0x101   :  { %v351_v35 = vadd.f32 %v350_v33, %v1172_v19  ;;  %v736_v38 = vmax.f32 %v220_v34, 0.0  ;;  %266 = vmatmul.f32.gmra.mxu0 %v86_v29  ;;  %v91_v34 = vld [vmem:[#allocation2 + $0xf8] sm:$0xff] }
 0x102   :  { %v481_v36 = vpop.f32.mrf.mxu2  ;;  %v612_v37 = vpop.f32.mrf.mxu3 }
 0x103   :  { %v737_v39 = vmax.f32 %v351_v35, 0.0  ;;  %v482_v40 = vadd.f32 %v481_v36, %v1174_v20  ;;  %v613_v41 = vadd.f32 %v612_v37, %v1176_v21  ;;  %397 = vmatmul.f32.gmra.mxu1 %v86_v29  ;;  %888 = vst [vmem:[#allocation8 + $0x140] sm:$0xff] %v736_v38 }
 0x105   :  { %v738_v43 = vmax.f32 %v482_v40, 0.0  ;;  %v739_v44 = vmax.f32 %v613_v41, 0.0  ;;  %889 = vst [vmem:[#allocation8 + $0x148] sm:$0xff] %v737_v39 }
 0x106   :  { %v222_v45 = vpop.f32.mrf.mxu0 }
 0x107   :  { %890 = vst [vmem:[#allocation8 + $0x150] sm:$0xff] %v738_v43  ;;  %531 = vmatmul.f32.gmra.mxu2 %v87_v42  ;;  %662 = vmatmul.f32.gmra.mxu3 %v87_v42  ;;  %v223_v47 = vadd.f32 %v222_v45, %v1170_v18 }
 0x108   :  { %891 = vst [vmem:[#allocation8 + $0x158] sm:$0xff] %v739_v44  ;;  %v353_v46 = vpop.f32.mrf.mxu1 }
 0x109   :  { %v354_v48 = vadd.f32 %v353_v46, %v1172_v19  ;;  %v740_v51 = vmax.f32 %v223_v47, 0.0  ;;  %269 = vmatmul.f32.gmra.mxu0 %v87_v42  ;;  %v92_v47 = vld [vmem:[#allocation2 + $0x100] sm:$0xff] }
 0x10a   :  { %v484_v49 = vpop.f32.mrf.mxu2  ;;  %v615_v50 = vpop.f32.mrf.mxu3 }
 0x10b   :  { %v741_v52 = vmax.f32 %v354_v48, 0.0  ;;  %v485_v53 = vadd.f32 %v484_v49, %v1174_v20  ;;  %v616_v54 = vadd.f32 %v615_v50, %v1176_v21  ;;  %400 = vmatmul.f32.gmra.mxu1 %v87_v42  ;;  %892 = vst [vmem:[#allocation8 + $0x160] sm:$0xff] %v740_v51 }
 0x10d   :  { %v742_v56 = vmax.f32 %v485_v53, 0.0  ;;  %v743_v57 = vmax.f32 %v616_v54, 0.0  ;;  %893 = vst [vmem:[#allocation8 + $0x168] sm:$0xff] %v741_v52 }
 0x10e   :  { %v225_v58 = vpop.f32.mrf.mxu0 }
 0x10f   :  { %894 = vst [vmem:[#allocation8 + $0x170] sm:$0xff] %v742_v56  ;;  %534 = vmatmul.f32.gmra.mxu2 %v88_v55  ;;  %665 = vmatmul.f32.gmra.mxu3 %v88_v55  ;;  %v226_v60 = vadd.f32 %v225_v58, %v1170_v18 }
 0x110   :  { %895 = vst [vmem:[#allocation8 + $0x178] sm:$0xff] %v743_v57  ;;  %v356_v59 = vpop.f32.mrf.mxu1 }
 0x111   :  { %v357_v61 = vadd.f32 %v356_v59, %v1172_v19  ;;  %v744_v0 = vmax.f32 %v226_v60, 0.0  ;;  %272 = vmatmul.f32.gmra.mxu0 %v88_v55  ;;  %v93_v60 = vld [vmem:[#allocation2 + $0x108] sm:$0xff] }
 0x112   :  { %v487_v62 = vpop.f32.mrf.mxu2  ;;  %v618_v63 = vpop.f32.mrf.mxu3 }
 0x113   :  { %v745_v1 = vmax.f32 %v357_v61, 0.0  ;;  %v488_v2 = vadd.f32 %v487_v62, %v1174_v20  ;;  %v619_v3 = vadd.f32 %v618_v63, %v1176_v21  ;;  %403 = vmatmul.f32.gmra.mxu1 %v88_v55  ;;  %896 = vst [vmem:[#allocation8 + $0x180] sm:$0xff] %v744_v0 }
 0x115   :  { %v746_v5 = vmax.f32 %v488_v2, 0.0  ;;  %v747_v6 = vmax.f32 %v619_v3, 0.0  ;;  %897 = vst [vmem:[#allocation8 + $0x188] sm:$0xff] %v745_v1 }
 0x116   :  { %v228_v7 = vpop.f32.mrf.mxu0 }
 0x117   :  { %898 = vst [vmem:[#allocation8 + $0x190] sm:$0xff] %v746_v5  ;;  %537 = vmatmul.f32.gmra.mxu2 %v89_v4  ;;  %668 = vmatmul.f32.gmra.mxu3 %v89_v4  ;;  %v229_v9 = vadd.f32 %v228_v7, %v1170_v18 }
 0x118   :  { %899 = vst [vmem:[#allocation8 + $0x198] sm:$0xff] %v747_v6  ;;  %v359_v8 = vpop.f32.mrf.mxu1 }
 0x119   :  { %v360_v10 = vadd.f32 %v359_v8, %v1172_v19  ;;  %v748_v13 = vmax.f32 %v229_v9, 0.0  ;;  %275 = vmatmul.f32.gmra.mxu0 %v89_v4  ;;  %v94_v9 = vld [vmem:[#allocation2 + $0x110] sm:$0xff] }
 0x11a   :  { %v490_v11 = vpop.f32.mrf.mxu2  ;;  %v621_v12 = vpop.f32.mrf.mxu3 }
 0x11b   :  { %v749_v14 = vmax.f32 %v360_v10, 0.0  ;;  %v491_v15 = vadd.f32 %v490_v11, %v1174_v20  ;;  %v622_v16 = vadd.f32 %v621_v12, %v1176_v21  ;;  %406 = vmatmul.f32.gmra.mxu1 %v89_v4  ;;  %900 = vst [vmem:[#allocation8 + $0x1a0] sm:$0xff] %v748_v13 }
 0x11d   :  { %v750_v22 = vmax.f32 %v491_v15, 0.0  ;;  %v751_v23 = vmax.f32 %v622_v16, 0.0  ;;  %901 = vst [vmem:[#allocation8 + $0x1a8] sm:$0xff] %v749_v14 }
 0x11e   :  { %v231_v24 = vpop.f32.mrf.mxu0 }
 0x11f   :  { %902 = vst [vmem:[#allocation8 + $0x1b0] sm:$0xff] %v750_v22  ;;  %540 = vmatmul.f32.gmra.mxu2 %v90_v17  ;;  %671 = vmatmul.f32.gmra.mxu3 %v90_v17  ;;  %v232_v26 = vadd.f32 %v231_v24, %v1170_v18 }
 0x120   :  { %903 = vst [vmem:[#allocation8 + $0x1b8] sm:$0xff] %v751_v23  ;;  %v362_v25 = vpop.f32.mrf.mxu1 }
 0x121   :  { %v363_v27 = vadd.f32 %v362_v25, %v1172_v19  ;;  %v752_v30 = vmax.f32 %v232_v26, 0.0  ;;  %278 = vmatmul.f32.gmra.mxu0 %v90_v17  ;;  %v95_v26 = vld [vmem:[#allocation2 + $0x118] sm:$0xff] }
 0x122   :  { %v493_v28 = vpop.f32.mrf.mxu2  ;;  %v624_v29 = vpop.f32.mrf.mxu3 }
 0x123   :  { %v753_v31 = vmax.f32 %v363_v27, 0.0  ;;  %v494_v32 = vadd.f32 %v493_v28, %v1174_v20  ;;  %v625_v33 = vadd.f32 %v624_v29, %v1176_v21  ;;  %409 = vmatmul.f32.gmra.mxu1 %v90_v17  ;;  %904 = vst [vmem:[#allocation8 + $0x1c0] sm:$0xff] %v752_v30 }
 0x125   :  { %v754_v35 = vmax.f32 %v494_v32, 0.0  ;;  %v755_v36 = vmax.f32 %v625_v33, 0.0  ;;  %905 = vst [vmem:[#allocation8 + $0x1c8] sm:$0xff] %v753_v31 }
 0x126   :  { %v234_v37 = vpop.f32.mrf.mxu0 }
 0x127   :  { %906 = vst [vmem:[#allocation8 + $0x1d0] sm:$0xff] %v754_v35  ;;  %543 = vmatmul.f32.gmra.mxu2 %v91_v34  ;;  %674 = vmatmul.f32.gmra.mxu3 %v91_v34  ;;  %v235_v39 = vadd.f32 %v234_v37, %v1170_v18 }
 0x128   :  { %907 = vst [vmem:[#allocation8 + $0x1d8] sm:$0xff] %v755_v36  ;;  %v365_v38 = vpop.f32.mrf.mxu1 }
 0x129   :  { %v366_v40 = vadd.f32 %v365_v38, %v1172_v19  ;;  %v756_v43 = vmax.f32 %v235_v39, 0.0  ;;  %281 = vmatmul.f32.gmra.mxu0 %v91_v34  ;;  %v96_v39 = vld [vmem:[#allocation2 + $0x120] sm:$0xff] }
 0x12a   :  { %v496_v41 = vpop.f32.mrf.mxu2  ;;  %v627_v42 = vpop.f32.mrf.mxu3 }
 0x12b   :  { %v757_v44 = vmax.f32 %v366_v40, 0.0  ;;  %v497_v45 = vadd.f32 %v496_v41, %v1174_v20  ;;  %v628_v46 = vadd.f32 %v627_v42, %v1176_v21  ;;  %412 = vmatmul.f32.gmra.mxu1 %v91_v34  ;;  %908 = vst [vmem:[#allocation8 + $0x1e0] sm:$0xff] %v756_v43 }
 0x12d   :  { %v758_v48 = vmax.f32 %v497_v45, 0.0  ;;  %v759_v49 = vmax.f32 %v628_v46, 0.0  ;;  %909 = vst [vmem:[#allocation8 + $0x1e8] sm:$0xff] %v757_v44 }
 0x12e   :  { %v237_v50 = vpop.f32.mrf.mxu0 }
 0x12f   :  { %910 = vst [vmem:[#allocation8 + $0x1f0] sm:$0xff] %v758_v48  ;;  %546 = vmatmul.f32.gmra.mxu2 %v92_v47  ;;  %677 = vmatmul.f32.gmra.mxu3 %v92_v47  ;;  %v238_v52 = vadd.f32 %v237_v50, %v1170_v18 }
 0x130   :  { %911 = vst [vmem:[#allocation8 + $0x1f8] sm:$0xff] %v759_v49  ;;  %v368_v51 = vpop.f32.mrf.mxu1 }
 0x131   :  { %v369_v53 = vadd.f32 %v368_v51, %v1172_v19  ;;  %v760_v56 = vmax.f32 %v238_v52, 0.0  ;;  %284 = vmatmul.f32.gmra.mxu0 %v92_v47  ;;  %v97_v52 = vld [vmem:[#allocation2 + $0x128] sm:$0xf] }
 0x132   :  { %v499_v54 = vpop.f32.mrf.mxu2  ;;  %v630_v55 = vpop.f32.mrf.mxu3 }
 0x133   :  { %v761_v57 = vmax.f32 %v369_v53, 0.0  ;;  %v500_v58 = vadd.f32 %v499_v54, %v1174_v20  ;;  %v631_v59 = vadd.f32 %v630_v55, %v1176_v21  ;;  %415 = vmatmul.f32.gmra.mxu1 %v92_v47  ;;  %912 = vst [vmem:[#allocation8 + $0x200] sm:$0xff] %v760_v56 }
 0x135   :  { %v762_v61 = vmax.f32 %v500_v58, 0.0  ;;  %v763_v62 = vmax.f32 %v631_v59, 0.0  ;;  %913 = vst [vmem:[#allocation8 + $0x208] sm:$0xff] %v761_v57 }
 0x136   :  { %v240_v63 = vpop.f32.mrf.mxu0 }
 0x137   :  { %914 = vst [vmem:[#allocation8 + $0x210] sm:$0xff] %v762_v61  ;;  %549 = vmatmul.f32.gmra.mxu2 %v93_v60  ;;  %680 = vmatmul.f32.gmra.mxu3 %v93_v60  ;;  %v241_v1 = vadd.f32 %v240_v63, %v1170_v18 }
 0x138   :  { %915 = vst [vmem:[#allocation8 + $0x218] sm:$0xff] %v763_v62  ;;  %v371_v0 = vpop.f32.mrf.mxu1 }
 0x139   :  { %v372_v2 = vadd.f32 %v371_v0, %v1172_v19  ;;  %v764_v5 = vmax.f32 %v241_v1, 0.0  ;;  %287 = vmatmul.f32.gmra.mxu0 %v93_v60 }
 0x13a   :  { %v502_v3 = vpop.f32.mrf.mxu2  ;;  %v633_v4 = vpop.f32.mrf.mxu3 }
 0x13b   :  { %v765_v6 = vmax.f32 %v372_v2, 0.0  ;;  %v503_v7 = vadd.f32 %v502_v3, %v1174_v20  ;;  %v634_v8 = vadd.f32 %v633_v4, %v1176_v21  ;;  %418 = vmatmul.f32.gmra.mxu1 %v93_v60  ;;  %916 = vst [vmem:[#allocation8 + $0x220] sm:$0xff] %v764_v5 }
 0x13d   :  { %v766_v10 = vmax.f32 %v503_v7, 0.0  ;;  %v767_v11 = vmax.f32 %v634_v8, 0.0  ;;  %917 = vst [vmem:[#allocation8 + $0x228] sm:$0xff] %v765_v6 }
 0x13e   :  { %v243_v12 = vpop.f32.mrf.mxu0 }
 0x13f   :  { %918 = vst [vmem:[#allocation8 + $0x230] sm:$0xff] %v766_v10  ;;  %552 = vmatmul.f32.gmra.mxu2 %v94_v9  ;;  %683 = vmatmul.f32.gmra.mxu3 %v94_v9  ;;  %v244_v14 = vadd.f32 %v243_v12, %v1170_v18 }
 0x140   :  { %919 = vst [vmem:[#allocation8 + $0x238] sm:$0xff] %v767_v11  ;;  %v374_v13 = vpop.f32.mrf.mxu1 }
 0x141   :  { %v375_v15 = vadd.f32 %v374_v13, %v1172_v19  ;;  %v768_v22 = vmax.f32 %v244_v14, 0.0  ;;  %290 = vmatmul.f32.gmra.mxu0 %v94_v9 }
 0x142   :  { %v505_v16 = vpop.f32.mrf.mxu2  ;;  %v636_v17 = vpop.f32.mrf.mxu3 }
 0x143   :  { %v769_v23 = vmax.f32 %v375_v15, 0.0  ;;  %v506_v24 = vadd.f32 %v505_v16, %v1174_v20  ;;  %v637_v25 = vadd.f32 %v636_v17, %v1176_v21  ;;  %421 = vmatmul.f32.gmra.mxu1 %v94_v9  ;;  %920 = vst [vmem:[#allocation8 + $0x240] sm:$0xff] %v768_v22 }
 0x145   :  { %v770_v27 = vmax.f32 %v506_v24, 0.0  ;;  %v771_v28 = vmax.f32 %v637_v25, 0.0  ;;  %921 = vst [vmem:[#allocation8 + $0x248] sm:$0xff] %v769_v23 }
 0x146   :  { %v246_v29 = vpop.f32.mrf.mxu0 }
 0x147   :  { %922 = vst [vmem:[#allocation8 + $0x250] sm:$0xff] %v770_v27  ;;  %555 = vmatmul.f32.gmra.mxu2 %v95_v26  ;;  %686 = vmatmul.f32.gmra.mxu3 %v95_v26  ;;  %v247_v31 = vadd.f32 %v246_v29, %v1170_v18 }
 0x148   :  { %923 = vst [vmem:[#allocation8 + $0x258] sm:$0xff] %v771_v28  ;;  %v377_v30 = vpop.f32.mrf.mxu1 }
 0x149   :  { %v378_v32 = vadd.f32 %v377_v30, %v1172_v19  ;;  %v772_v35 = vmax.f32 %v247_v31, 0.0  ;;  %293 = vmatmul.f32.gmra.mxu0 %v95_v26 }
 0x14a   :  { %v508_v33 = vpop.f32.mrf.mxu2  ;;  %v639_v34 = vpop.f32.mrf.mxu3 }
 0x14b   :  { %v773_v36 = vmax.f32 %v378_v32, 0.0  ;;  %v509_v37 = vadd.f32 %v508_v33, %v1174_v20  ;;  %v640_v38 = vadd.f32 %v639_v34, %v1176_v21  ;;  %424 = vmatmul.f32.gmra.mxu1 %v95_v26  ;;  %924 = vst [vmem:[#allocation8 + $0x260] sm:$0xff] %v772_v35 }
 0x14d   :  { %v774_v40 = vmax.f32 %v509_v37, 0.0  ;;  %v775_v41 = vmax.f32 %v640_v38, 0.0  ;;  %925 = vst [vmem:[#allocation8 + $0x268] sm:$0xff] %v773_v36 }
 0x14e   :  { %v249_v42 = vpop.f32.mrf.mxu0 }
 0x14f   :  { %926 = vst [vmem:[#allocation8 + $0x270] sm:$0xff] %v774_v40  ;;  %558 = vmatmul.f32.gmra.mxu2 %v96_v39  ;;  %689 = vmatmul.f32.gmra.mxu3 %v96_v39  ;;  %v250_v44 = vadd.f32 %v249_v42, %v1170_v18 }
 0x150   :  { %927 = vst [vmem:[#allocation8 + $0x278] sm:$0xff] %v775_v41  ;;  %v380_v43 = vpop.f32.mrf.mxu1 }
 0x151   :  { %v381_v45 = vadd.f32 %v380_v43, %v1172_v19  ;;  %v776_v48 = vmax.f32 %v250_v44, 0.0  ;;  %296 = vmatmul.f32.gmra.mxu0 %v96_v39 }
 0x152   :  { %v511_v46 = vpop.f32.mrf.mxu2  ;;  %v642_v47 = vpop.f32.mrf.mxu3 }
 0x153   :  { %v777_v49 = vmax.f32 %v381_v45, 0.0  ;;  %v512_v50 = vadd.f32 %v511_v46, %v1174_v20  ;;  %v643_v51 = vadd.f32 %v642_v47, %v1176_v21  ;;  %427 = vmatmul.f32.gmra.mxu1 %v96_v39  ;;  %928 = vst [vmem:[#allocation8 + $0x280] sm:$0xff] %v776_v48 }
 0x155   :  { %v778_v53 = vmax.f32 %v512_v50, 0.0  ;;  %v779_v54 = vmax.f32 %v643_v51, 0.0  ;;  %929 = vst [vmem:[#allocation8 + $0x288] sm:$0xff] %v777_v49 }
 0x156   :  { %v252_v55 = vpop.f32.mrf.mxu0 }
 0x157   :  { %930 = vst [vmem:[#allocation8 + $0x290] sm:$0xff] %v778_v53  ;;  %561 = vmatmul.f32.gmra.mxu2 %v97_v52  ;;  %692 = vmatmul.f32.gmra.mxu3 %v97_v52  ;;  %v253_v57 = vadd.f32 %v252_v55, %v1170_v18 }
 0x158   :  { %931 = vst [vmem:[#allocation8 + $0x298] sm:$0xff] %v779_v54  ;;  %v383_v56 = vpop.f32.mrf.mxu1 }
 0x159   :  { %v384_v58 = vadd.f32 %v383_v56, %v1172_v19  ;;  %v780_v61 = vmax.f32 %v253_v57, 0.0  ;;  %299 = vmatmul.f32.gmra.mxu0 %v97_v52 }
 0x15a   :  { %v514_v59 = vpop.f32.mrf.mxu2  ;;  %v645_v60 = vpop.f32.mrf.mxu3 }
 0x15b   :  { %v781_v62 = vmax.f32 %v384_v58, 0.0  ;;  %v515_v63 = vadd.f32 %v514_v59, %v1174_v20  ;;  %v646_v0 = vadd.f32 %v645_v60, %v1176_v21  ;;  %430 = vmatmul.f32.gmra.mxu1 %v97_v52  ;;  %932 = vst [vmem:[#allocation8 + $0x2a0] sm:$0xff] %v780_v61 }
 0x15d   :  { %v782_v1 = vmax.f32 %v515_v63, 0.0  ;;  %v783_v2 = vmax.f32 %v646_v0, 0.0  ;;  %933 = vst [vmem:[#allocation8 + $0x2a8] sm:$0xff] %v781_v62 }
 0x15e   :  { %v255_v3 = vpop.f32.mrf.mxu0 }
 0x15f   :  { %934 = vst [vmem:[#allocation8 + $0x2b0] sm:$0xff] %v782_v1  ;;  %v256_v5 = vadd.f32 %v255_v3, %v1170_v18 }
 0x160   :  { %935 = vst [vmem:[#allocation8 + $0x2b8] sm:$0xff] %v783_v2  ;;  %v386_v4 = vpop.f32.mrf.mxu1 }
 0x161   :  { %v387_v6 = vadd.f32 %v386_v4, %v1172_v19  ;;  %v784_v9 = vmax.f32 %v256_v5, 0.0 }
 0x162   :  { %v517_v7 = vpop.f32.mrf.mxu2  ;;  %v648_v8 = vpop.f32.mrf.mxu3 }
 0x163   :  { %v785_v10 = vmax.f32 %v387_v6, 0.0  ;;  %v518_v11 = vadd.f32 %v517_v7, %v1174_v20  ;;  %v649_v12 = vadd.f32 %v648_v8, %v1176_v21  ;;  %936 = vst [vmem:[#allocation8 + $0x2c0] sm:$0xff] %v784_v9 }
 0x165   :  { %v786_v13 = vmax.f32 %v518_v11, 0.0  ;;  %v787_v14 = vmax.f32 %v649_v12, 0.0  ;;  %937 = vst [vmem:[#allocation8 + $0x2c8] sm:$0xff] %v785_v10 }
 0x166   :  { %v258_v15 = vpop.f32.mrf.mxu0 }
 0x167   :  { %938 = vst [vmem:[#allocation8 + $0x2d0] sm:$0xff] %v786_v13  ;;  %v259_v17 = vadd.f32 %v258_v15, %v1170_v18 }
 0x168   :  { %939 = vst [vmem:[#allocation8 + $0x2d8] sm:$0xff] %v787_v14  ;;  %v389_v16 = vpop.f32.mrf.mxu1 }
 0x169   :  { %v390_v22 = vadd.f32 %v389_v16, %v1172_v19  ;;  %v788_v25 = vmax.f32 %v259_v17, 0.0 }
 0x16a   :  { %v520_v23 = vpop.f32.mrf.mxu2  ;;  %v651_v24 = vpop.f32.mrf.mxu3 }
 0x16b   :  { %v789_v26 = vmax.f32 %v390_v22, 0.0  ;;  %v521_v27 = vadd.f32 %v520_v23, %v1174_v20  ;;  %v652_v28 = vadd.f32 %v651_v24, %v1176_v21  ;;  %940 = vst [vmem:[#allocation8 + $0x2e0] sm:$0xff] %v788_v25 }
 0x16d   :  { %v790_v29 = vmax.f32 %v521_v27, 0.0  ;;  %v791_v30 = vmax.f32 %v652_v28, 0.0  ;;  %941 = vst [vmem:[#allocation8 + $0x2e8] sm:$0xff] %v789_v26 }
 0x16e   :  { %v261_v31 = vpop.f32.mrf.mxu0 }
 0x16f   :  { %942 = vst [vmem:[#allocation8 + $0x2f0] sm:$0xff] %v790_v29  ;;  %v262_v33 = vadd.f32 %v261_v31, %v1170_v18 }
 0x170   :  { %943 = vst [vmem:[#allocation8 + $0x2f8] sm:$0xff] %v791_v30  ;;  %v392_v32 = vpop.f32.mrf.mxu1 }
 0x171   :  { %v393_v34 = vadd.f32 %v392_v32, %v1172_v19  ;;  %v792_v37 = vmax.f32 %v262_v33, 0.0 }
 0x172   :  { %v523_v35 = vpop.f32.mrf.mxu2  ;;  %v654_v36 = vpop.f32.mrf.mxu3 }
 0x173   :  { %v793_v38 = vmax.f32 %v393_v34, 0.0  ;;  %v524_v39 = vadd.f32 %v523_v35, %v1174_v20  ;;  %v655_v40 = vadd.f32 %v654_v36, %v1176_v21  ;;  %944 = vst [vmem:[#allocation8 + $0x300] sm:$0xff] %v792_v37 }
 0x175   :  { %v794_v41 = vmax.f32 %v524_v39, 0.0  ;;  %v795_v42 = vmax.f32 %v655_v40, 0.0  ;;  %945 = vst [vmem:[#allocation8 + $0x308] sm:$0xff] %v793_v38 }
 0x176   :  { %v264_v43 = vpop.f32.mrf.mxu0 }
 0x177   :  { %946 = vst [vmem:[#allocation8 + $0x310] sm:$0xff] %v794_v41  ;;  %v265_v45 = vadd.f32 %v264_v43, %v1170_v18 }
 0x178   :  { %947 = vst [vmem:[#allocation8 + $0x318] sm:$0xff] %v795_v42  ;;  %v395_v44 = vpop.f32.mrf.mxu1 }
 0x179   :  { %v396_v46 = vadd.f32 %v395_v44, %v1172_v19  ;;  %v796_v49 = vmax.f32 %v265_v45, 0.0 }
 0x17a   :  { %v526_v47 = vpop.f32.mrf.mxu2  ;;  %v657_v48 = vpop.f32.mrf.mxu3 }
 0x17b   :  { %v797_v50 = vmax.f32 %v396_v46, 0.0  ;;  %v527_v51 = vadd.f32 %v526_v47, %v1174_v20  ;;  %v658_v52 = vadd.f32 %v657_v48, %v1176_v21  ;;  %948 = vst [vmem:[#allocation8 + $0x320] sm:$0xff] %v796_v49 }
 0x17d   :  { %v798_v53 = vmax.f32 %v527_v51, 0.0  ;;  %v799_v54 = vmax.f32 %v658_v52, 0.0  ;;  %949 = vst [vmem:[#allocation8 + $0x328] sm:$0xff] %v797_v50 }
 0x17e   :  { %v267_v55 = vpop.f32.mrf.mxu0 }
 0x17f   :  { %950 = vst [vmem:[#allocation8 + $0x330] sm:$0xff] %v798_v53  ;;  %v268_v57 = vadd.f32 %v267_v55, %v1170_v18 }
 0x180   :  { %951 = vst [vmem:[#allocation8 + $0x338] sm:$0xff] %v799_v54  ;;  %v398_v56 = vpop.f32.mrf.mxu1 }
 0x181   :  { %v399_v58 = vadd.f32 %v398_v56, %v1172_v19  ;;  %v800_v61 = vmax.f32 %v268_v57, 0.0 }
 0x182   :  { %v529_v59 = vpop.f32.mrf.mxu2  ;;  %v660_v60 = vpop.f32.mrf.mxu3 }
 0x183   :  { %v801_v62 = vmax.f32 %v399_v58, 0.0  ;;  %v530_v63 = vadd.f32 %v529_v59, %v1174_v20  ;;  %v661_v0 = vadd.f32 %v660_v60, %v1176_v21  ;;  %952 = vst [vmem:[#allocation8 + $0x340] sm:$0xff] %v800_v61 }
 0x185   :  { %v802_v1 = vmax.f32 %v530_v63, 0.0  ;;  %v803_v2 = vmax.f32 %v661_v0, 0.0  ;;  %953 = vst [vmem:[#allocation8 + $0x348] sm:$0xff] %v801_v62 }
 0x186   :  { %v270_v3 = vpop.f32.mrf.mxu0 }
 0x187   :  { %954 = vst [vmem:[#allocation8 + $0x350] sm:$0xff] %v802_v1  ;;  %v271_v5 = vadd.f32 %v270_v3, %v1170_v18 }
 0x188   :  { %955 = vst [vmem:[#allocation8 + $0x358] sm:$0xff] %v803_v2  ;;  %v401_v4 = vpop.f32.mrf.mxu1 }
 0x189   :  { %v402_v6 = vadd.f32 %v401_v4, %v1172_v19  ;;  %v804_v9 = vmax.f32 %v271_v5, 0.0 }
 0x18a   :  { %v532_v7 = vpop.f32.mrf.mxu2  ;;  %v663_v8 = vpop.f32.mrf.mxu3 }
 0x18b   :  { %v805_v10 = vmax.f32 %v402_v6, 0.0  ;;  %v533_v11 = vadd.f32 %v532_v7, %v1174_v20  ;;  %v664_v12 = vadd.f32 %v663_v8, %v1176_v21  ;;  %956 = vst [vmem:[#allocation8 + $0x360] sm:$0xff] %v804_v9 }
 0x18d   :  { %v806_v13 = vmax.f32 %v533_v11, 0.0  ;;  %v807_v14 = vmax.f32 %v664_v12, 0.0  ;;  %957 = vst [vmem:[#allocation8 + $0x368] sm:$0xff] %v805_v10 }
 0x18e   :  { %v273_v15 = vpop.f32.mrf.mxu0 }
 0x18f   :  { %958 = vst [vmem:[#allocation8 + $0x370] sm:$0xff] %v806_v13  ;;  %v274_v17 = vadd.f32 %v273_v15, %v1170_v18 }
 0x190   :  { %959 = vst [vmem:[#allocation8 + $0x378] sm:$0xff] %v807_v14  ;;  %v404_v16 = vpop.f32.mrf.mxu1 }
 0x191   :  { %v405_v22 = vadd.f32 %v404_v16, %v1172_v19  ;;  %v808_v25 = vmax.f32 %v274_v17, 0.0 }
 0x192   :  { %v535_v23 = vpop.f32.mrf.mxu2  ;;  %v666_v24 = vpop.f32.mrf.mxu3 }
 0x193   :  { %v809_v26 = vmax.f32 %v405_v22, 0.0  ;;  %v536_v27 = vadd.f32 %v535_v23, %v1174_v20  ;;  %v667_v28 = vadd.f32 %v666_v24, %v1176_v21  ;;  %960 = vst [vmem:[#allocation8 + $0x380] sm:$0xff] %v808_v25 }
 0x195   :  { %v810_v29 = vmax.f32 %v536_v27, 0.0  ;;  %v811_v30 = vmax.f32 %v667_v28, 0.0  ;;  %961 = vst [vmem:[#allocation8 + $0x388] sm:$0xff] %v809_v26 }
 0x196   :  { %v276_v31 = vpop.f32.mrf.mxu0 }
 0x197   :  { %962 = vst [vmem:[#allocation8 + $0x390] sm:$0xff] %v810_v29  ;;  %v277_v33 = vadd.f32 %v276_v31, %v1170_v18 }
 0x198   :  { %963 = vst [vmem:[#allocation8 + $0x398] sm:$0xff] %v811_v30  ;;  %v407_v32 = vpop.f32.mrf.mxu1 }
 0x199   :  { %v408_v34 = vadd.f32 %v407_v32, %v1172_v19  ;;  %v812_v37 = vmax.f32 %v277_v33, 0.0 }
 0x19a   :  { %v538_v35 = vpop.f32.mrf.mxu2  ;;  %v669_v36 = vpop.f32.mrf.mxu3 }
 0x19b   :  { %v813_v38 = vmax.f32 %v408_v34, 0.0  ;;  %v539_v39 = vadd.f32 %v538_v35, %v1174_v20  ;;  %v670_v40 = vadd.f32 %v669_v36, %v1176_v21  ;;  %964 = vst [vmem:[#allocation8 + $0x3a0] sm:$0xff] %v812_v37 }
 0x19d   :  { %v814_v41 = vmax.f32 %v539_v39, 0.0  ;;  %v815_v42 = vmax.f32 %v670_v40, 0.0  ;;  %965 = vst [vmem:[#allocation8 + $0x3a8] sm:$0xff] %v813_v38 }
 0x19e   :  { %v279_v43 = vpop.f32.mrf.mxu0 }
 0x19f   :  { %966 = vst [vmem:[#allocation8 + $0x3b0] sm:$0xff] %v814_v41  ;;  %v280_v45 = vadd.f32 %v279_v43, %v1170_v18 }
 0x1a0   :  { %967 = vst [vmem:[#allocation8 + $0x3b8] sm:$0xff] %v815_v42  ;;  %v410_v44 = vpop.f32.mrf.mxu1 }
 0x1a1   :  { %v411_v46 = vadd.f32 %v410_v44, %v1172_v19  ;;  %v816_v49 = vmax.f32 %v280_v45, 0.0 }
 0x1a2   :  { %v541_v47 = vpop.f32.mrf.mxu2  ;;  %v672_v48 = vpop.f32.mrf.mxu3 }
 0x1a3   :  { %v817_v50 = vmax.f32 %v411_v46, 0.0  ;;  %v542_v51 = vadd.f32 %v541_v47, %v1174_v20  ;;  %v673_v52 = vadd.f32 %v672_v48, %v1176_v21  ;;  %968 = vst [vmem:[#allocation8 + $0x3c0] sm:$0xff] %v816_v49 }
 0x1a5   :  { %v818_v53 = vmax.f32 %v542_v51, 0.0  ;;  %v819_v54 = vmax.f32 %v673_v52, 0.0  ;;  %969 = vst [vmem:[#allocation8 + $0x3c8] sm:$0xff] %v817_v50 }
 0x1a6   :  { %v282_v55 = vpop.f32.mrf.mxu0 }
 0x1a7   :  { %970 = vst [vmem:[#allocation8 + $0x3d0] sm:$0xff] %v818_v53  ;;  %v283_v57 = vadd.f32 %v282_v55, %v1170_v18 }
 0x1a8   :  { %971 = vst [vmem:[#allocation8 + $0x3d8] sm:$0xff] %v819_v54  ;;  %v413_v56 = vpop.f32.mrf.mxu1 }
 0x1a9   :  { %v414_v58 = vadd.f32 %v413_v56, %v1172_v19  ;;  %v820_v61 = vmax.f32 %v283_v57, 0.0 }
 0x1aa   :  { %v544_v59 = vpop.f32.mrf.mxu2  ;;  %v675_v60 = vpop.f32.mrf.mxu3 }
 0x1ab   :  { %v821_v62 = vmax.f32 %v414_v58, 0.0  ;;  %v545_v63 = vadd.f32 %v544_v59, %v1174_v20  ;;  %v676_v0 = vadd.f32 %v675_v60, %v1176_v21  ;;  %972 = vst [vmem:[#allocation8 + $0x3e0] sm:$0xff] %v820_v61 }
 0x1ad   :  { %v822_v1 = vmax.f32 %v545_v63, 0.0  ;;  %v823_v2 = vmax.f32 %v676_v0, 0.0  ;;  %973 = vst [vmem:[#allocation8 + $0x3e8] sm:$0xff] %v821_v62 }
 0x1ae   :  { %v285_v3 = vpop.f32.mrf.mxu0 }
 0x1af   :  { %974 = vst [vmem:[#allocation8 + $0x3f0] sm:$0xff] %v822_v1  ;;  %v286_v5 = vadd.f32 %v285_v3, %v1170_v18 }
 0x1b0   :  { %975 = vst [vmem:[#allocation8 + $0x3f8] sm:$0xff] %v823_v2  ;;  %v416_v4 = vpop.f32.mrf.mxu1 }
 0x1b1   :  { %v417_v6 = vadd.f32 %v416_v4, %v1172_v19  ;;  %v824_v9 = vmax.f32 %v286_v5, 0.0 }
 0x1b2   :  { %v547_v7 = vpop.f32.mrf.mxu2  ;;  %v678_v8 = vpop.f32.mrf.mxu3 }
 0x1b3   :  { %v825_v10 = vmax.f32 %v417_v6, 0.0  ;;  %v548_v11 = vadd.f32 %v547_v7, %v1174_v20  ;;  %v679_v12 = vadd.f32 %v678_v8, %v1176_v21  ;;  %976 = vst [vmem:[#allocation8 + $0x400] sm:$0xff] %v824_v9 }
 0x1b5   :  { %v826_v13 = vmax.f32 %v548_v11, 0.0  ;;  %v827_v14 = vmax.f32 %v679_v12, 0.0  ;;  %977 = vst [vmem:[#allocation8 + $0x408] sm:$0xff] %v825_v10 }
 0x1b6   :  { %v288_v15 = vpop.f32.mrf.mxu0 }
 0x1b7   :  { %978 = vst [vmem:[#allocation8 + $0x410] sm:$0xff] %v826_v13  ;;  %v289_v17 = vadd.f32 %v288_v15, %v1170_v18 }
 0x1b8   :  { %979 = vst [vmem:[#allocation8 + $0x418] sm:$0xff] %v827_v14  ;;  %v419_v16 = vpop.f32.mrf.mxu1 }
 0x1b9   :  { %v420_v22 = vadd.f32 %v419_v16, %v1172_v19  ;;  %v828_v25 = vmax.f32 %v289_v17, 0.0 }
 0x1ba   :  { %v550_v23 = vpop.f32.mrf.mxu2  ;;  %v681_v24 = vpop.f32.mrf.mxu3 }
 0x1bb   :  { %v829_v26 = vmax.f32 %v420_v22, 0.0  ;;  %v551_v27 = vadd.f32 %v550_v23, %v1174_v20  ;;  %v682_v28 = vadd.f32 %v681_v24, %v1176_v21  ;;  %980 = vst [vmem:[#allocation8 + $0x420] sm:$0xff] %v828_v25 }
 0x1bd   :  { %v830_v29 = vmax.f32 %v551_v27, 0.0  ;;  %v831_v30 = vmax.f32 %v682_v28, 0.0  ;;  %981 = vst [vmem:[#allocation8 + $0x428] sm:$0xff] %v829_v26 }
 0x1be   :  { %v291_v31 = vpop.f32.mrf.mxu0 }
 0x1bf   :  { %982 = vst [vmem:[#allocation8 + $0x430] sm:$0xff] %v830_v29  ;;  %v292_v33 = vadd.f32 %v291_v31, %v1170_v18 }
 0x1c0   :  { %983 = vst [vmem:[#allocation8 + $0x438] sm:$0xff] %v831_v30  ;;  %v422_v32 = vpop.f32.mrf.mxu1 }
 0x1c1   :  { %v423_v34 = vadd.f32 %v422_v32, %v1172_v19  ;;  %v832_v37 = vmax.f32 %v292_v33, 0.0 }
 0x1c2   :  { %v553_v35 = vpop.f32.mrf.mxu2  ;;  %v684_v36 = vpop.f32.mrf.mxu3 }
 0x1c3   :  { %v833_v38 = vmax.f32 %v423_v34, 0.0  ;;  %v554_v39 = vadd.f32 %v553_v35, %v1174_v20  ;;  %v685_v40 = vadd.f32 %v684_v36, %v1176_v21  ;;  %984 = vst [vmem:[#allocation8 + $0x440] sm:$0xff] %v832_v37 }
 0x1c5   :  { %v834_v41 = vmax.f32 %v554_v39, 0.0  ;;  %v835_v42 = vmax.f32 %v685_v40, 0.0  ;;  %985 = vst [vmem:[#allocation8 + $0x448] sm:$0xff] %v833_v38 }
 0x1c6   :  { %v294_v43 = vpop.f32.mrf.mxu0 }
 0x1c7   :  { %986 = vst [vmem:[#allocation8 + $0x450] sm:$0xff] %v834_v41  ;;  %v295_v45 = vadd.f32 %v294_v43, %v1170_v18 }
 0x1c8   :  { %987 = vst [vmem:[#allocation8 + $0x458] sm:$0xff] %v835_v42  ;;  %v425_v44 = vpop.f32.mrf.mxu1 }
 0x1c9   :  { %v426_v46 = vadd.f32 %v425_v44, %v1172_v19  ;;  %v836_v49 = vmax.f32 %v295_v45, 0.0 }
 0x1ca   :  { %v556_v47 = vpop.f32.mrf.mxu2  ;;  %v687_v48 = vpop.f32.mrf.mxu3 }
 0x1cb   :  { %v837_v50 = vmax.f32 %v426_v46, 0.0  ;;  %v557_v51 = vadd.f32 %v556_v47, %v1174_v20  ;;  %v688_v52 = vadd.f32 %v687_v48, %v1176_v21  ;;  %988 = vst [vmem:[#allocation8 + $0x460] sm:$0xff] %v836_v49 }
 0x1cd   :  { %v838_v53 = vmax.f32 %v557_v51, 0.0  ;;  %v839_v54 = vmax.f32 %v688_v52, 0.0  ;;  %989 = vst [vmem:[#allocation8 + $0x468] sm:$0xff] %v837_v50 }
 0x1ce   :  { %v297_v55 = vpop.f32.mrf.mxu0 }
 0x1cf   :  { %990 = vst [vmem:[#allocation8 + $0x470] sm:$0xff] %v838_v53  ;;  %v298_v57 = vadd.f32 %v297_v55, %v1170_v18 }
 0x1d0   :  { %991 = vst [vmem:[#allocation8 + $0x478] sm:$0xff] %v839_v54  ;;  %v428_v56 = vpop.f32.mrf.mxu1 }
 0x1d1   :  { %v429_v58 = vadd.f32 %v428_v56, %v1172_v19  ;;  %v840_v61 = vmax.f32 %v298_v57, 0.0 }
 0x1d2   :  { %v559_v59 = vpop.f32.mrf.mxu2  ;;  %v690_v60 = vpop.f32.mrf.mxu3 }
 0x1d3   :  { %v841_v62 = vmax.f32 %v429_v58, 0.0  ;;  %v560_v63 = vadd.f32 %v559_v59, %v1174_v20  ;;  %v691_v0 = vadd.f32 %v690_v60, %v1176_v21  ;;  %992 = vst [vmem:[#allocation8 + $0x480] sm:$0xff] %v840_v61 }
 0x1d5   :  { %v842_v1 = vmax.f32 %v560_v63, 0.0  ;;  %v843_v2 = vmax.f32 %v691_v0, 0.0  ;;  %993 = vst [vmem:[#allocation8 + $0x488] sm:$0xff] %v841_v62 }
 0x1d6   :  { %v300_v3 = vpop.f32.mrf.mxu0 }
 0x1d7   :  { %994 = vst [vmem:[#allocation8 + $0x490] sm:$0xff] %v842_v1  ;;  %v301_v5 = vadd.f32 %v300_v3, %v1170_v18 }
 0x1d8   :  { %995 = vst [vmem:[#allocation8 + $0x498] sm:$0xff] %v843_v2  ;;  %v431_v4 = vpop.f32.mrf.mxu1 }
 0x1d9   :  { %v432_v6 = vadd.f32 %v431_v4, %v1172_v19  ;;  %v844_v9 = vmax.f32 %v301_v5, 0.0 }
 0x1da   :  { %v562_v7 = vpop.f32.mrf.mxu2  ;;  %v693_v8 = vpop.f32.mrf.mxu3 }
 0x1db   :  { %v845_v10 = vmax.f32 %v432_v6, 0.0  ;;  %v563_v11 = vadd.f32 %v562_v7, %v1174_v20  ;;  %v694_v12 = vadd.f32 %v693_v8, %v1176_v21  ;;  %996 = vst [vmem:[#allocation8 + $0x4a0] sm:$0xf] %v844_v9 }
 0x1dd   :  { %v846_v13 = vmax.f32 %v563_v11, 0.0  ;;  %v847_v14 = vmax.f32 %v694_v12, 0.0  ;;  %997 = vst [vmem:[#allocation8 + $0x4a8] sm:$0xf] %v845_v10 }
 0x1df   :  { %998 = vst [vmem:[#allocation8 + $0x4b0] sm:$0xf] %v846_v13 }
 0x1e0   :  { %999 = vst [vmem:[#allocation8 + $0x4b8] sm:$0xf] %v847_v14 }
 0x1e1   :  { %1012 = dma.vmem_to_hbm [thread:$0]  %s1005_s29, 19456, %s1007_s5, [#allocation4], %s1131_s20, %s1131_s20, %s1132_s21  }
 0x1e2   :  { %1128 = dma.done.wait [#allocation4], 19456  }
 0x1e3   :  { %1129 = vsyncadd [#allocation4], 4294947840 }
 0x1e4   :  { %1017 = vsyncpa [#allocation3], 1 }
 0x1e5   :  { %1018 = vsyncpa [#allocation6], 1 }
 0x1e6   :  { %1019 = vsyncpa [#allocation4], 1 }

</bundles_post_ra>
